<compile_context>
chip_gen: v6e
topology: v6e:2x2x1
jax: 0.10.0
libtpu: 0.0.40
codegen_flags: <defaults>
</compile_context>

<pallas_src>
import math

import jax
import jax.numpy as jnp
from jax.experimental import pallas as pl
from jax.experimental.pallas import tpu as pltpu

EPS = 1e-4                       # canonical FF-layer norm epsilon
_INV_SQRT2 = 1.0 / math.sqrt(2.0)
_HAS_BUFFERED = hasattr(pl, "Buffered")


def _vmem_capacity_bytes():
    """Physical VMEM of the current generation (conservative fallback: v7x)."""
    try:
        info = pltpu.get_tpu_info()
        cap = getattr(info, "vmem_capacity_bytes", None)
        if cap:
            return int(cap)
    except Exception:
        pass
    return 64 * 1024 * 1024


_VMEM_CAP = _vmem_capacity_bytes()
# Leave headroom for compiler scratch / spills: ~80% of physical, <= 100 MiB.
#   v5e/v6e (128 MiB) -> 100 MiB ; v7x (64 MiB) -> ~51 MiB.
_VMEM_LIMIT = min(int(_VMEM_CAP * 0.80), 100 * 1024 * 1024)
# Fused-path residency budget (weights counted once thanks to Buffered(1)).
_FUSED_BUDGET = int(_VMEM_LIMIT * 0.75)


def _gelu_exact(h):
    # Exact (erf) GELU, matching torch.nn.GELU() default.
    return 0.5 * h * (1.0 + jax.lax.erf(h * _INV_SQRT2))


def _ff_layer_math(x_f32, w, b):
    """Shared per-layer math: L2 row-norm -> matmul (MXU) -> bias -> exact GELU."""
    norm = jnp.sqrt(jnp.sum(x_f32 * x_f32, axis=-1, keepdims=True))
    # approx=True -> EUP slot (otherwise idle); ~1e-3 accuracy, inside tolerance.
    x_dir = x_f32 * pl.reciprocal(norm + EPS, approx=True)
    h = jnp.dot(x_dir.astype(w.dtype), w, preferred_element_type=jnp.float32)
    h = h + b.astype(jnp.float32)
    return _gelu_exact(h)


# ----------------------------------------------------------------------------
# Tiled single-layer kernel (general path: large dims / weights too big to fuse)
# ----------------------------------------------------------------------------
def ff_layer_kernel(x_ref, w_ref, b_ref, o_ref, xdir_ref):
    # Normalize the batch tile ONCE per batch tile (j == 0) and cache the
    # already-cast result in VMEM scratch; all output-feature tiles reuse it.
    @pl.when(pl.program_id(1) == 0)
    def _():
        x = x_ref[...].astype(jnp.float32)          # (tm, Din) full row
        norm = jnp.sqrt(jnp.sum(x * x, axis=-1, keepdims=True))
        x_dir = x * pl.reciprocal(norm + EPS, approx=True)
        xdir_ref[...] = x_dir.astype(xdir_ref.dtype)

    h = jnp.dot(xdir_ref[...], w_ref[...], preferred_element_type=jnp.float32)
    h = h + b_ref[...].astype(jnp.float32)
    o_ref[...] = _gelu_exact(h).astype(o_ref.dtype)


def _tile_bytes(tm, tn, din, x_it, out_it):
    xdir = tm * din * 2                 # scratch (weight dtype, bf16)
    x = 2 * tm * din * x_it             # double-buffered input tile
    w = 2 * din * tn * 2                # double-buffered bf16 weight tile
    bias = 2 * tn * 4
    out = 2 * tm * tn * out_it
    return xdir + x + w + bias + out


def _select_tiles(B, din, dout, x_it, out_it, vmem_limit):
    """Largest tm first (cuts weight re-streaming, the binding resource on v5e),
    then largest tn, that fits ~60% of the VMEM budget."""
    budget = int(vmem_limit * 0.6)
    for tm in (512, 384, 256, 128, 64, 32, 16, 8):
        tm_eff = min(tm, B)
        for tn in (512, 384, 256, 128):
            tn_eff = min(tn, dout)
            if _tile_bytes(tm_eff, tn_eff, din, x_it, out_it) <= budget:
                return tm_eff, tn_eff
    return min(128, B), min(128, dout)


def ff_layer_tiled(x, w, b, *, out_dtype=None, tm=None, tn=None):
    """One FFLayer forward, tiled over (batch, out-features)."""
    B, din = x.shape
    din_w, dout = w.shape
    assert din == din_w and b.shape == (1, dout)
    out_dtype = out_dtype if out_dtype is not None else x.dtype

    if tm is None or tn is None:
        stm, stn = _select_tiles(B, din, dout, x.dtype.itemsize,
                                 jnp.dtype(out_dtype).itemsize, _VMEM_LIMIT)
        tm = tm if tm is not None else stm
        tn = tn if tn is not None else stn
    tm = min(tm, B)
    tn = min(tn, dout)
    grid = (pl.cdiv(B, tm), pl.cdiv(dout, tn))

    return pl.pallas_call(
        ff_layer_kernel,
        out_shape=jax.ShapeDtypeStruct((B, dout), out_dtype),
        grid=grid,
        in_specs=[
            # Full Din row per batch tile: the row-norm reduction must see the
            # whole row (no K-tiling).  Same block for all j -> no re-DMA.
            pl.BlockSpec((tm, din), lambda i, j: (i, 0)),
            pl.BlockSpec((din, tn), lambda i, j: (0, j)),
            pl.BlockSpec((1, tn), lambda i, j: (0, j)),
        ],
        out_specs=pl.BlockSpec((tm, tn), lambda i, j: (i, j)),
        scratch_shapes=[pltpu.VMEM((tm, din), w.dtype)],   # cached x_dir
        compiler_params=pltpu.CompilerParams(
            dimension_semantics=("parallel", "arbitrary"),
            vmem_limit_bytes=_VMEM_LIMIT,
        ),
    )(x, w, b)


# ----------------------------------------------------------------------------
# Fully-fused network kernel (small-dims path: all weights resident in VMEM)
# ----------------------------------------------------------------------------
def _make_fused_kernel(num_layers):
    def kernel(x_ref, *refs):
        o_ref = refs[-1]
        x = x_ref[...].astype(jnp.float32)
        for layer in range(num_layers):
            w = refs[2 * layer][...]
            b = refs[2 * layer + 1][...]
            x = _ff_layer_math(x, w, b)       # activations stay in VMEM
        o_ref[...] = x.astype(o_ref.dtype)
    return kernel


def _fused_pallas_call(x, params, tm, use_buffered):
    B, d0 = x.shape
    num_layers = len(params)
    dout = params[-1][0].shape[1]

    def resident_spec(shape):
        # Constant index_map -> double buffering only doubles resident VMEM.
        if use_buffered:
            return pl.BlockSpec(shape, lambda i: (0, 0),
                                pipeline_mode=pl.Buffered(1))
        return pl.BlockSpec(shape, lambda i: (0, 0))

    in_specs = [pl.BlockSpec((tm, d0), lambda i: (i, 0))]
    args = [x]
    for (w, b) in params:
        di, do = w.shape
        in_specs.append(resident_spec((di, do)))
        in_specs.append(resident_spec((1, do)))
        args.extend([w, b])

    return pl.pallas_call(
        _make_fused_kernel(num_layers),
        out_shape=jax.ShapeDtypeStruct((B, dout), x.dtype),
        grid=(pl.cdiv(B, tm),),
        in_specs=in_specs,
        out_specs=pl.BlockSpec((tm, dout), lambda i: (i, 0)),
        compiler_params=pltpu.CompilerParams(
            dimension_semantics=("parallel",),
            vmem_limit_bytes=_VMEM_LIMIT,
        ),
    )(*args)


def ff_network_fused(x, params, *, tm=128):
    """Whole layer chain in one pallas_call; grid only over batch tiles."""
    B = x.shape[0]
    tm = min(tm, B)
    # v7x megacore: keep >=2 parallel programs when the batch allows it so both
    # TensorCores get work (no effect on single-TC v5e/v6e).
    if pl.cdiv(B, tm) < 2 and B >= 16 and (B // 2) % 8 == 0:
        tm = B // 2
    if _HAS_BUFFERED:
        try:
            return _fused_pallas_call(x, params, tm, use_buffered=True)
        except Exception:
            pass  # fall back to default (double-buffered) resident specs
    return _fused_pallas_call(x, params, tm, use_buffered=False)


# ----------------------------------------------------------------------------
# Module wrapper
# ----------------------------------------------------------------------------
class FFNetworkPallas:
    """Pallas equivalent of FFNetwork (eval-mode forward)."""

    def __init__(self, dims, key, param_dtype=jnp.bfloat16):
        assert len(dims) >= 1, "len(dims) should be greater than equal to 1"
        self.dims = list(dims)
        self.params = []
        for d in range(len(dims) - 1):
            key, wk, bk = jax.random.split(key, 3)
            # Mimic torch.nn.Linear init: U(-1/sqrt(fan_in), 1/sqrt(fan_in)).
            bound = 1.0 / math.sqrt(dims[d])
            # Weight stored pre-transposed (Din, Dout) in bf16 (MXU-native,
            # halves weight DMA); bias stays f32.
            w = jax.random.uniform(wk, (dims[d], dims[d + 1]), jnp.float32,
                                   -bound, bound).astype(param_dtype)
            b = jax.random.uniform(bk, (1, dims[d + 1]), jnp.float32,
                                   -bound, bound)
            self.params.append((w, b))

    def __len__(self):
        return len(self.params)

    def __iter__(self):
        return iter(self.params)

    def _fits_fused(self, batch, tm=128, budget_bytes=None):
        """VMEM budget check for the fused path (weights counted once:
        Buffered(1) resident specs)."""
        if budget_bytes is None:
            budget_bytes = _FUSED_BUDGET
        tm = min(tm, batch)
        total = 0
        for w, b in self.params:
            total += w.size * w.dtype.itemsize + b.size * b.dtype.itemsize
        total += 2 * tm * self.dims[0] * 4      # input tile (double-buffered, f32)
        total += 2 * tm * self.dims[-1] * 4     # output tile (double-buffered)
        total += 2 * tm * max(self.dims) * 4    # live f32 activations headroom
        return total <= budget_bytes

    def __call__(self, x, *, fuse=None):
        if not self.params:
            return x
        if fuse is None:
            fuse = self._fits_fused(x.shape[0])
        if fuse:
            return ff_network_fused(x, self.params)
        # Chained per-layer path: bf16 intermediate activations (halves HBM
        # traffic); last layer keeps the input dtype.
        orig_dtype = x.dtype
        last = len(self.params) - 1
        for idx, (w, b) in enumerate(self.params):
            out_dtype = orig_dtype if idx == last else jnp.bfloat16
            x = ff_layer_tiled(x, w, b, out_dtype=out_dtype)
        return x


def _reference_forward(x, params, inter_dtype=jnp.float32):
    """Pure-JAX reference (same bf16-weight matmul contract as the kernels).
    `inter_dtype` mirrors the dtype of inter-layer activations (f32 for the
    fused path, bf16 for the chained path's HBM round trip)."""
    num_layers = len(params)
    h = x
    for idx, (w, b) in enumerate(params):
        xf = h.astype(jnp.float32)
        norm = jnp.sqrt(jnp.sum(xf * xf, axis=-1, keepdims=True))
        x_dir = xf / (norm + EPS)
        y = jnp.dot(x_dir.astype(w.dtype), w,
                    preferred_element_type=jnp.float32) + b.astype(jnp.float32)
        y = 0.5 * y * (1.0 + jax.lax.erf(y * _INV_SQRT2))
        h = y if idx == num_layers - 1 else y.astype(inter_dtype)
    return h


if __name__ == "__main__":
    key = jax.random.PRNGKey(0)
    key, xk, pk = jax.random.split(key, 3)

    # Small but lane-dense shapes: feature dims are multiples of 128 so MXU
    # tiles are full and output stores are unmasked.
    dims = [128, 256, 128]      # FFNetwork(dims) -> two FFLayers
    batch = 16

    x = jax.random.normal(xk, (batch, dims[0]), dtype=jnp.float32)
    net = FFNetworkPallas(dims, pk, param_dtype=jnp.bfloat16)

    out_fused = jax.block_until_ready(net(x, fuse=True))    # single fused call
    out_tiled = jax.block_until_ready(net(x, fuse=False))   # per-layer tiled path

    ref_f32 = _reference_forward(x, net.params, inter_dtype=jnp.float32)
    ref_bf16 = _reference_forward(x, net.params, inter_dtype=jnp.bfloat16)

    assert out_fused.shape == (batch, dims[-1])
    assert out_tiled.shape == (batch, dims[-1])
    assert jnp.allclose(out_fused, ref_f32, atol=2e-3, rtol=2e-3), "fused path mismatch"
    assert jnp.allclose(out_tiled, ref_bf16, atol=3e-3, rtol=3e-3), "tiled path mismatch"

    print("KERNEL_OK")
</pallas_src>

<mosaic_0001>
module attributes {stable_mosaic.version = 11 : i64} {
  func.func @kernel(%arg0: i32, %arg1: memref<8x128xf32, #tpu.memory_space<vmem>>, %arg2: memref<128x256xbf16, #tpu.memory_space<vmem>>, %arg3: memref<1x256xf32, #tpu.memory_space<vmem>>, %arg4: memref<256x128xbf16, #tpu.memory_space<vmem>>, %arg5: memref<1x128xf32, #tpu.memory_space<vmem>>, %arg6: memref<8x128xf32, #tpu.memory_space<vmem>>) attributes {dimension_semantics = [#tpu.dimension_semantics<parallel>], iteration_bounds = array<i64: 2>, scalar_prefetch = 0 : i64, scratch_operands = 0 : i64, tpu.core_type = #tpu.core_type<tc>, window_params = [{transform_indices = @transform_0, window_bounds = array<i64: 8, 128>}, {pipeline_mode = #tpu.pipeline_mode<synchronous>, transform_indices = @transform_1, window_bounds = array<i64: 128, 256>}, {pipeline_mode = #tpu.pipeline_mode<synchronous>, transform_indices = @transform_2, window_bounds = array<i64: 1, 256>}, {pipeline_mode = #tpu.pipeline_mode<synchronous>, transform_indices = @transform_3, window_bounds = array<i64: 256, 128>}, {pipeline_mode = #tpu.pipeline_mode<synchronous>, transform_indices = @transform_4, window_bounds = array<i64: 1, 128>}, {transform_indices = @transform_5, window_bounds = array<i64: 8, 128>}]} {
    %c0 = arith.constant 0 : index
    %c0_0 = arith.constant 0 : index
    %0 = vector.load %arg1[%c0, %c0_0] : memref<8x128xf32, #tpu.memory_space<vmem>>, vector<8x128xf32>
    %c0_1 = arith.constant 0 : index
    %c0_2 = arith.constant 0 : index
    %1 = vector.load %arg2[%c0_1, %c0_2] : memref<128x256xbf16, #tpu.memory_space<vmem>>, vector<128x256xbf16>
    %c0_3 = arith.constant 0 : index
    %c0_4 = arith.constant 0 : index
    %2 = vector.load %arg3[%c0_3, %c0_4] : memref<1x256xf32, #tpu.memory_space<vmem>>, vector<1x256xf32>
    %3 = arith.mulf %0, %0 : vector<8x128xf32>
    %cst = arith.constant dense<0.000000e+00> : vector<8xf32>
    %4 = vector.multi_reduction <add>, %3, %cst [1] : vector<8x128xf32> to vector<8xf32>
    %5 = vector.shape_cast %4 : vector<8xf32> to vector<8x1xf32>
    %6 = math.sqrt %5 : vector<8x1xf32>
    %cst_5 = arith.constant 9.99999974E-5 : f32
    %7 = vector.broadcast %cst_5 : f32 to vector<8x1xf32>
    %8 = arith.addf %6, %7 : vector<8x1xf32>
    %9 = tpu.reciprocal %8 {approx = true} : vector<8x1xf32> -> vector<8x1xf32>
    %10 = vector.broadcast %9 : vector<8x1xf32> to vector<8x128xf32>
    %11 = arith.mulf %0, %10 : vector<8x128xf32>
    %12 = arith.truncf %11 : vector<8x128xf32> to vector<8x128xbf16>
    %cst_6 = arith.constant dense<0.000000e+00> : vector<8x256xf32>
    %13 = tpu.matmul %12, %1, %cst_6 {dimension_numbers = #tpu.dot_dimension_numbers<[1], [0], [0], [1], [0, 0, 1, 1], [], []>} : vector<8x128xbf16>, vector<128x256xbf16>, vector<8x256xf32> -> vector<8x256xf32>
    %14 = vector.broadcast %2 : vector<1x256xf32> to vector<8x256xf32>
    %15 = arith.addf %13, %14 : vector<8x256xf32>
    %cst_7 = arith.constant 5.000000e-01 : f32
    %16 = vector.broadcast %cst_7 : f32 to vector<8x256xf32>
    %17 = arith.mulf %16, %15 : vector<8x256xf32>
    %cst_8 = arith.constant 0.707106769 : f32
    %18 = vector.broadcast %cst_8 : f32 to vector<8x256xf32>
    %19 = arith.mulf %15, %18 : vector<8x256xf32>
    %20 = math.erf %19 : vector<8x256xf32>
    %cst_9 = arith.constant 1.000000e+00 : f32
    %21 = vector.broadcast %cst_9 : f32 to vector<8x256xf32>
    %22 = arith.addf %21, %20 : vector<8x256xf32>
    %23 = arith.mulf %17, %22 : vector<8x256xf32>
    %c0_10 = arith.constant 0 : index
    %c0_11 = arith.constant 0 : index
    %24 = vector.load %arg4[%c0_10, %c0_11] : memref<256x128xbf16, #tpu.memory_space<vmem>>, vector<256x128xbf16>
    %c0_12 = arith.constant 0 : index
    %c0_13 = arith.constant 0 : index
    %25 = vector.load %arg5[%c0_12, %c0_13] : memref<1x128xf32, #tpu.memory_space<vmem>>, vector<1x128xf32>
    %26 = arith.mulf %23, %23 : vector<8x256xf32>
    %cst_14 = arith.constant dense<0.000000e+00> : vector<8xf32>
    %27 = vector.multi_reduction <add>, %26, %cst_14 [1] : vector<8x256xf32> to vector<8xf32>
    %28 = vector.shape_cast %27 : vector<8xf32> to vector<8x1xf32>
    %29 = math.sqrt %28 : vector<8x1xf32>
    %cst_15 = arith.constant 9.99999974E-5 : f32
    %30 = vector.broadcast %cst_15 : f32 to vector<8x1xf32>
    %31 = arith.addf %29, %30 : vector<8x1xf32>
    %32 = tpu.reciprocal %31 {approx = true} : vector<8x1xf32> -> vector<8x1xf32>
    %33 = vector.broadcast %32 : vector<8x1xf32> to vector<8x256xf32>
    %34 = arith.mulf %23, %33 : vector<8x256xf32>
    %35 = arith.truncf %34 : vector<8x256xf32> to vector<8x256xbf16>
    %cst_16 = arith.constant dense<0.000000e+00> : vector<8x128xf32>
    %36 = tpu.matmul %35, %24, %cst_16 {dimension_numbers = #tpu.dot_dimension_numbers<[1], [0], [0], [1], [0, 0, 1, 1], [], []>} : vector<8x256xbf16>, vector<256x128xbf16>, vector<8x128xf32> -> vector<8x128xf32>
    %37 = vector.broadcast %25 : vector<1x128xf32> to vector<8x128xf32>
    %38 = arith.addf %36, %37 : vector<8x128xf32>
    %cst_17 = arith.constant 5.000000e-01 : f32
    %39 = vector.broadcast %cst_17 : f32 to vector<8x128xf32>
    %40 = arith.mulf %39, %38 : vector<8x128xf32>
    %cst_18 = arith.constant 0.707106769 : f32
    %41 = vector.broadcast %cst_18 : f32 to vector<8x128xf32>
    %42 = arith.mulf %38, %41 : vector<8x128xf32>
    %43 = math.erf %42 : vector<8x128xf32>
    %cst_19 = arith.constant 1.000000e+00 : f32
    %44 = vector.broadcast %cst_19 : f32 to vector<8x128xf32>
    %45 = arith.addf %44, %43 : vector<8x128xf32>
    %46 = arith.mulf %40, %45 : vector<8x128xf32>
    %c0_20 = arith.constant 0 : index
    %c0_21 = arith.constant 0 : index
    %47 = vector.load %arg6[%c0_20, %c0_21] : memref<8x128xf32, #tpu.memory_space<vmem>>, vector<8x128xf32>
    tpu.vector_store %arg6[%c0_20, %c0_21], %46 {strides = array<i32>} : memref<8x128xf32, #tpu.memory_space<vmem>>, vector<8x128xf32>,
    return
  }
  func.func @transform_0(%arg0: i32) -> (i32, i32) {
    %c0_i32 = arith.constant 0 : i32
    %c0_i32_0 = arith.constant 0 : i32
    return %arg0, %c0_i32 : i32, i32
  }
  func.func @transform_1(%arg0: i32) -> (i32, i32) {
    %c0_i32 = arith.constant 0 : i32
    %c0_i32_0 = arith.constant 0 : i32
    %c0_i32_1 = arith.constant 0 : i32
    return %c0_i32, %c0_i32_0 : i32, i32
  }
  func.func @transform_2(%arg0: i32) -> (i32, i32) {
    %c0_i32 = arith.constant 0 : i32
    %c0_i32_0 = arith.constant 0 : i32
    %c0_i32_1 = arith.constant 0 : i32
    return %c0_i32, %c0_i32_0 : i32, i32
  }
  func.func @transform_3(%arg0: i32) -> (i32, i32) {
    %c0_i32 = arith.constant 0 : i32
    %c0_i32_0 = arith.constant 0 : i32
    %c0_i32_1 = arith.constant 0 : i32
    return %c0_i32, %c0_i32_0 : i32, i32
  }
  func.func @transform_4(%arg0: i32) -> (i32, i32) {
    %c0_i32 = arith.constant 0 : i32
    %c0_i32_0 = arith.constant 0 : i32
    %c0_i32_1 = arith.constant 0 : i32
    return %c0_i32, %c0_i32_0 : i32, i32
  }
  func.func @transform_5(%arg0: i32) -> (i32, i32) {
    %c0_i32 = arith.constant 0 : i32
    %c0_i32_0 = arith.constant 0 : i32
    return %arg0, %c0_i32 : i32, i32
  }
}

module attributes {stable_mosaic.version = 11 : i64} {
  func.func @kernel(%arg0: i32, %arg1: memref<8x128xf32, #tpu.memory_space<vmem>>, %arg2: memref<128x256xbf16, #tpu.memory_space<vmem>>, %arg3: memref<1x256xf32, #tpu.memory_space<vmem>>, %arg4: memref<256x128xbf16, #tpu.memory_space<vmem>>, %arg5: memref<1x128xf32, #tpu.memory_space<vmem>>, %arg6: memref<8x128xf32, #tpu.memory_space<vmem>>) attributes {dimension_semantics = [#tpu.dimension_semantics<parallel>], iteration_bounds = array<i64: 2>, scalar_prefetch = 0 : i64, scratch_operands = 0 : i64, tpu.core_type = #tpu.core_type<tc>, window_params = [{transform_indices = @transform_0, window_bounds = array<i64: 8, 128>}, {pipeline_mode = #tpu.pipeline_mode<synchronous>, transform_indices = @transform_1, window_bounds = array<i64: 128, 256>}, {pipeline_mode = #tpu.pipeline_mode<synchronous>, transform_indices = @transform_2, window_bounds = array<i64: 1, 256>}, {pipeline_mode = #tpu.pipeline_mode<synchronous>, transform_indices = @transform_3, window_bounds = array<i64: 256, 128>}, {pipeline_mode = #tpu.pipeline_mode<synchronous>, transform_indices = @transform_4, window_bounds = array<i64: 1, 128>}, {transform_indices = @transform_5, window_bounds = array<i64: 8, 128>}]} {
    %c0 = arith.constant 0 : index
    %c0_0 = arith.constant 0 : index
    %0 = vector.load %arg1[%c0, %c0_0] : memref<8x128xf32, #tpu.memory_space<vmem>>, vector<8x128xf32>
    %c0_1 = arith.constant 0 : index
    %c0_2 = arith.constant 0 : index
    %1 = vector.load %arg2[%c0_1, %c0_2] : memref<128x256xbf16, #tpu.memory_space<vmem>>, vector<128x256xbf16>
    %c0_3 = arith.constant 0 : index
    %c0_4 = arith.constant 0 : index
    %2 = vector.load %arg3[%c0_3, %c0_4] : memref<1x256xf32, #tpu.memory_space<vmem>>, vector<1x256xf32>
    %3 = arith.mulf %0, %0 : vector<8x128xf32>
    %cst = arith.constant dense<0.000000e+00> : vector<8xf32>
    %4 = vector.multi_reduction <add>, %3, %cst [1] : vector<8x128xf32> to vector<8xf32>
    %5 = vector.shape_cast %4 : vector<8xf32> to vector<8x1xf32>
    %6 = math.sqrt %5 : vector<8x1xf32>
    %cst_5 = arith.constant 9.99999974E-5 : f32
    %7 = vector.broadcast %cst_5 : f32 to vector<8x1xf32>
    %8 = arith.addf %6, %7 : vector<8x1xf32>
    %9 = tpu.reciprocal %8 {approx = true} : vector<8x1xf32> -> vector<8x1xf32>
    %10 = vector.broadcast %9 : vector<8x1xf32> to vector<8x128xf32>
    %11 = arith.mulf %0, %10 : vector<8x128xf32>
    %12 = arith.truncf %11 : vector<8x128xf32> to vector<8x128xbf16>
    %cst_6 = arith.constant dense<0.000000e+00> : vector<8x256xf32>
    %13 = tpu.matmul %12, %1, %cst_6 {dimension_numbers = #tpu.dot_dimension_numbers<[1], [0], [0], [1], [0, 0, 1, 1], [], []>} : vector<8x128xbf16>, vector<128x256xbf16>, vector<8x256xf32> -> vector<8x256xf32>
    %14 = vector.broadcast %2 : vector<1x256xf32> to vector<8x256xf32>
    %15 = arith.addf %13, %14 : vector<8x256xf32>
    %cst_7 = arith.constant 5.000000e-01 : f32
    %16 = vector.broadcast %cst_7 : f32 to vector<8x256xf32>
    %17 = arith.mulf %16, %15 : vector<8x256xf32>
    %cst_8 = arith.constant 0.707106769 : f32
    %18 = vector.broadcast %cst_8 : f32 to vector<8x256xf32>
    %19 = arith.mulf %15, %18 : vector<8x256xf32>
    %20 = math.erf %19 : vector<8x256xf32>
    %cst_9 = arith.constant 1.000000e+00 : f32
    %21 = vector.broadcast %cst_9 : f32 to vector<8x256xf32>
    %22 = arith.addf %21, %20 : vector<8x256xf32>
    %23 = arith.mulf %17, %22 : vector<8x256xf32>
    %c0_10 = arith.constant 0 : index
    %c0_11 = arith.constant 0 : index
    %24 = vector.load %arg4[%c0_10, %c0_11] : memref<256x128xbf16, #tpu.memory_space<vmem>>, vector<256x128xbf16>
    %c0_12 = arith.constant 0 : index
    %c0_13 = arith.constant 0 : index
    %25 = vector.load %arg5[%c0_12, %c0_13] : memref<1x128xf32, #tpu.memory_space<vmem>>, vector<1x128xf32>
    %26 = arith.mulf %23, %23 : vector<8x256xf32>
    %cst_14 = arith.constant dense<0.000000e+00> : vector<8xf32>
    %27 = vector.multi_reduction <add>, %26, %cst_14 [1] : vector<8x256xf32> to vector<8xf32>
    %28 = vector.shape_cast %27 : vector<8xf32> to vector<8x1xf32>
    %29 = math.sqrt %28 : vector<8x1xf32>
    %cst_15 = arith.constant 9.99999974E-5 : f32
    %30 = vector.broadcast %cst_15 : f32 to vector<8x1xf32>
    %31 = arith.addf %29, %30 : vector<8x1xf32>
    %32 = tpu.reciprocal %31 {approx = true} : vector<8x1xf32> -> vector<8x1xf32>
    %33 = vector.broadcast %32 : vector<8x1xf32> to vector<8x256xf32>
    %34 = arith.mulf %23, %33 : vector<8x256xf32>
    %35 = arith.truncf %34 : vector<8x256xf32> to vector<8x256xbf16>
    %cst_16 = arith.constant dense<0.000000e+00> : vector<8x128xf32>
    %36 = tpu.matmul %35, %24, %cst_16 {dimension_numbers = #tpu.dot_dimension_numbers<[1], [0], [0], [1], [0, 0, 1, 1], [], []>} : vector<8x256xbf16>, vector<256x128xbf16>, vector<8x128xf32> -> vector<8x128xf32>
    %37 = vector.broadcast %25 : vector<1x128xf32> to vector<8x128xf32>
    %38 = arith.addf %36, %37 : vector<8x128xf32>
    %cst_17 = arith.constant 5.000000e-01 : f32
    %39 = vector.broadcast %cst_17 : f32 to vector<8x128xf32>
    %40 = arith.mulf %39, %38 : vector<8x128xf32>
    %cst_18 = arith.constant 0.707106769 : f32
    %41 = vector.broadcast %cst_18 : f32 to vector<8x128xf32>
    %42 = arith.mulf %38, %41 : vector<8x128xf32>
    %43 = math.erf %42 : vector<8x128xf32>
    %cst_19 = arith.constant 1.000000e+00 : f32
    %44 = vector.broadcast %cst_19 : f32 to vector<8x128xf32>
    %45 = arith.addf %44, %43 : vector<8x128xf32>
    %46 = arith.mulf %40, %45 : vector<8x128xf32>
    %c0_20 = arith.constant 0 : index
    %c0_21 = arith.constant 0 : index
    %47 = vector.load %arg6[%c0_20, %c0_21] : memref<8x128xf32, #tpu.memory_space<vmem>>, vector<8x128xf32>
    tpu.vector_store %arg6[%c0_20, %c0_21], %46 {strides = array<i32>} : memref<8x128xf32, #tpu.memory_space<vmem>>, vector<8x128xf32>,
    return
  }
  func.func @transform_0(%arg0: i32) -> (i32, i32) {
    %c0_i32 = arith.constant 0 : i32
    %c0_i32_0 = arith.constant 0 : i32
    return %arg0, %c0_i32 : i32, i32
  }
  func.func @transform_1(%arg0: i32) -> (i32, i32) {
    %c0_i32 = arith.constant 0 : i32
    %c0_i32_0 = arith.constant 0 : i32
    %c0_i32_1 = arith.constant 0 : i32
    return %c0_i32, %c0_i32_0 : i32, i32
  }
  func.func @transform_2(%arg0: i32) -> (i32, i32) {
    %c0_i32 = arith.constant 0 : i32
    %c0_i32_0 = arith.constant 0 : i32
    %c0_i32_1 = arith.constant 0 : i32
    return %c0_i32, %c0_i32_0 : i32, i32
  }
  func.func @transform_3(%arg0: i32) -> (i32, i32) {
    %c0_i32 = arith.constant 0 : i32
    %c0_i32_0 = arith.constant 0 : i32
    %c0_i32_1 = arith.constant 0 : i32
    return %c0_i32, %c0_i32_0 : i32, i32
  }
  func.func @transform_4(%arg0: i32) -> (i32, i32) {
    %c0_i32 = arith.constant 0 : i32
    %c0_i32_0 = arith.constant 0 : i32
    %c0_i32_1 = arith.constant 0 : i32
    return %c0_i32, %c0_i32_0 : i32, i32
  }
  func.func @transform_5(%arg0: i32) -> (i32, i32) {
    %c0_i32 = arith.constant 0 : i32
    %c0_i32_0 = arith.constant 0 : i32
    return %arg0, %c0_i32 : i32, i32
  }
}

</mosaic_0001>

<bundles_post_ra>
// kernel: tpu_custom_call.1
= control target key start
LH: loop header
LB: loop body
LE: loop exit
PB: predicated region body
PF: predicated region fallthrough
CT: control target
= control target key end

     0   :  { %10 = vsyncpa [#allocation3], 0  ;;  %s1307_s0 = inlined_call_operand.hbm [shape: f32[16,128], index: 0, kind: input, shape index: {}]   ;;  %s1308_s1 = inlined_call_operand.hbm [shape: bf16[128,256], index: 1, kind: input, shape index: {}]   ;;  %s1309_s2 = inlined_call_operand.vmem [shape: f32[1,256], index: 2, kind: input, shape index: {}]   ;;  %s1310_s3 = inlined_call_operand.hbm [shape: bf16[256,128], index: 3, kind: input, shape index: {}]   ;;  %s1311_s4 = inlined_call_operand.vmem [shape: f32[1,128], index: 4, kind: input, shape index: {}]   ;;  %s1312_s5 = inlined_call_operand.hbm [shape: f32[16,128], index: 5, kind: output, shape index: {}]  }
   0x1   :  { %12 = vsyncpa [#allocation3 + $0x1], 0 }
   0x2   :  { %13 = vsyncpa [#allocation6], 0 }
   0x3   :  { %14 = vsyncpa [#allocation4], 0 }
   0x4   :  { %16 = vsyncpa [#allocation4 + $0x1], 0  ;;  %s1132_s18 = smov 0   ;;  %s1134_s19 = smov 0  }
   0x5   :  { %s1136_s20 = smov 0   ;;  %s1138_s21 = smov 0  }
   0x6 LB: > { %s1153_s22 = sadd.s32 4294967295, %s1091_s21   ;;  %s746_s23 = sadd.s32 4294967294, %s1091_s21   ;;  %s1091_s21 = sphi %s1138_s21, %s1334_s21   ;;  %s1087_s20 = sphi %s1136_s20, %s1333_s20   ;;  %s1083_s19 = sphi %s1134_s19, %s1332_s19   ;;  %s1079_s18 = sphi %s1132_s18, %s1331_s18  }
   0x7   : > { %p42_p0 = scmp.ne.s32.totalorder %s1083_s19, %s1079_s18  ;;  %p1313_p1 = scmp.eq.s32.totalorder %s1153_s22, 0 }
   0x8   : > { %p156_p3 = scmp.eq.s32.totalorder %s746_s23, 1  ;;  %p747_p5 = scmp.ge.s32.totalorder %s1091_s21, 1 }
   0x9   : > { %p1162_p4 = por %p1313_p1, %p42_p0  ;;  %p163_p7 = scmp.lt.s32.totalorder %s1091_s21, 3 }
   0xa   : > { %p1167_p6 = por %p156_p3, %p42_p0  ;;  %s1093_s27 = smov [#allocation5]  }
   0xb   : > { %s1317_s24 = scalar_select %p1162_p4, 1, 0 }
   0xc   : > { %s1318_s25 = scalar_select %p1167_p6, 1, 0 }
   0xd   : > { %p1172_p8 = pnand %p747_p5, %p163_p7  ;;  %s175_s28 = sshll.u32 %s1093_s27, 4  ;;  %s176_s28 = int_to_ptr.vmem [resolvable:$true] %s175_s28 }
   0xe   : > { %s1094_s30 = smov [#allocation7]   ;;  %s954_s7 = scalar_lea.vmem %s176_s28, 2048 }
   0xf   : > { %s1319_s26 = scalar_select %p1172_p8, 1, 0 }
  0x10   : > { %p829_p9 = pneg %p1172_p8  ;;  %s191_s6 = sshll.u32 %s1094_s30, 4  ;;  %s192_s6 = int_to_ptr.vmem [resolvable:$true] %s191_s6 }
  0x11   : > { %p955_p13 = scmp.ne.s32.totalorder %s176_s28, %s954_s7  ;;  %p962_p5 = scmp.lt.s32.totalorder %s176_s28, %s176_s28 }
  0x12   : > { %p1181_p11 = pnand %p829_p9, %p1313_p1  ;;  %p963_p7 = scmp.lt.s32.totalorder %s954_s7, %s954_s7 }
  0x14   : > { %p945_p12 = pneg %p1181_p11  ;;  %p964_p10 = por %p963_p7, %p962_p5 }
  0x16   : > { %p957_p0 = pnand %p955_p13, %p945_p12 }
  0x18   : > { %p958_p3 = pneg %p957_p0 }
  0x1a   : > { %p965_p9 = pnand %p964_p10, %p958_p3 }
  0x1c   : > { %968 = shalt.err (!%p965_p9)
}
  0x1d   : > { %s1095_s8 = smov 128   ;;  %s1096_s9 = smov 8  }
  0x1e   : > { %832 = dma.hbm_to_vmem [thread:$0]  (!%p1181_p11), %s1308_s1, 2048, %s176_s28, [#allocation6], %s1095_s8, %s1095_s8, %s1096_s9  }
  0x1f   : > { %s980_s12 = scalar_lea.vmem %s192_s6, 2048  ;;  %p988_p2 = scmp.lt.s32.totalorder %s192_s6, %s192_s6 }
  0x20   : > { %p981_p1 = scmp.ne.s32.totalorder %s192_s6, %s980_s12  ;;  %p989_p6 = scmp.lt.s32.totalorder %s980_s12, %s980_s12 }
  0x22   : > { %p983_p13 = pnand %p981_p1, %p945_p12  ;;  %p990_p5 = por %p989_p6, %p988_p2 }
  0x24   : > { %p984_p0 = pneg %p983_p13 }
  0x26   : > { %p991_p10 = pnand %p990_p5, %p984_p0 }
  0x28   : > { %994 = shalt.err (!%p991_p10)
}
  0x29   : > { %s1097_s13 = smov 64   ;;  %s1098_s14 = smov 4  }
  0x2a   : > { %835 = dma.hbm_to_vmem [thread:$0]  (!%p1181_p11), %s1310_s3, 2048, %s192_s6, [#allocation6], %s1097_s13, %s1097_s13, %s1098_s14  }
  0x2b   : > { %s1204_s17 = sadd.s32 1, %s1091_s21   ;;  %s29_s27 = sadd.s32 1, %s1087_s20 }
  0x2c   : > { %s26_s23 = ssub.s32 %s1091_s21, %s1204_s17  ;;  %p36_p2 = scmp.ne.s32.totalorder %s1087_s20, %s1083_s19 }
  0x2d   : > { %p27_p1 = scmp.eq.s32.totalorder %s26_s23, 0  ;;  %p37_p6 = scmp.eq.s32.totalorder %s1091_s21, 0 }
  0x2e   : > { %p1321_p3 = scmp.eq.s32.totalorder %s1153_s22, 1  ;;  %p846_p9 = scmp.lt.s32.totalorder %s1091_s21, 2 }
  0x2f   : > { %s1213_s28 = scalar_select %p27_p1, %s1087_s20, %s29_s27  }
  0x30   : > { %p38_p12 = por %p37_p6, %p36_p2  ;;  %p1217_p7 = por %p1321_p3, %p36_p2 }
  0x31   : > { %s208_s29 = sand.u32 1, %s1087_s20   ;;  %s752_s6 = sshll.u32 %s1091_s21, 7 }
  0x32   : > { %s1322_s30 = scalar_select %p1217_p7, 1, 0 }
  0x33   : > { %s751_s7 = sshll.u32 %s208_s29, 3  ;;  %s1227_s10 = scalar_lea.hbm %s1307_s0, %s752_s6 }
  0x34   : > { %s212_s11 = scalar_lea.vmem [#allocation2], %s751_s7  ;;  %p1229_p11 = pnand %p846_p9, %p38_p12 }
  0x35   : > { %s219_s12 = sshll.u32 %s212_s11, 4  ;;  %s209_s14 = scalar_lea.sflag [#allocation3], %s208_s29  ;;  %s220_s12 = int_to_ptr.vmem [resolvable:$true] %s219_s12 }
  0x36   : > { %s995_s15 = scalar_lea.hbm %s1227_s10, 128  ;;  %p997_p0 = pneg %p1229_p11 }
  0x37   : > { %p996_p13 = scmp.ne.s32.totalorder %s1227_s10, %s995_s15  ;;  %s1000_s27 = scalar_lea.hbm %s1307_s0, 256 }
  0x38   : > { %p1001_p1 = scmp.lt.s32.totalorder %s1227_s10, %s1307_s0  ;;  %p1002_p2 = scmp.lt.s32.totalorder %s1000_s27, %s995_s15 }
  0x39   : > { %p998_p5 = pnand %p997_p0, %p996_p13 }
  0x3a   : > { %p1003_p6 = por %p1002_p2, %p1001_p1 }
  0x3b   : > { %p999_p10 = pneg %p998_p5 }
  0x3d   : > { %p1004_p12 = pnand %p1003_p6, %p999_p10 }
  0x3f   : > { %1007 = shalt.err (!%p1004_p12)
}
  0x40   : > { %s1008_s8 = scalar_lea.vmem %s220_s12, 128  ;;  %s1099_s29 = smov [#allocation2]  }
  0x41   : > { %p1009_p3 = scmp.ne.s32.totalorder %s220_s12, %s1008_s8  ;;  %s1013_s9 = sshll.u32 %s1099_s29, 4  ;;  %s1014_s9 = int_to_ptr.vmem [resolvable:$false] %s1013_s9 }
  0x42   : > { %s1015_s11 = scalar_lea.vmem %s1014_s9, 256  ;;  %p1016_p13 = scmp.lt.s32.totalorder %s220_s12, %s1014_s9 }
  0x43   : > { %p1011_p9 = pnand %p1009_p3, %p997_p0  ;;  %p1017_p5 = scmp.lt.s32.totalorder %s1015_s11, %s1008_s8 }
  0x45   : > { %p1012_p7 = pneg %p1011_p9  ;;  %p1018_p4 = por %p1017_p5, %p1016_p13 }
  0x47   : > { %p1019_p8 = pnand %p1018_p4, %p1012_p7 }
  0x49   : > { %1022 = shalt.err (!%p1019_p8)
}
  0x4a   : > { %839 = dma.hbm_to_vmem [thread:$0]  (!%p1229_p11), %s1227_s10, 128, %s220_s12, %s209_s14  }
  0x4b   : > { %p1324_p10 = scmp.ne.s32.totalorder %s1319_s26, 0 }
  0x4c   : > { %s1250_s15 = sand.u32 (!%p1324_p10), 1, %s1083_s19   ;;  %p1325_p4 = scmp.ne.s32.totalorder (!%p1324_p10), %s1317_s24, 0 }
  0x4d   : > { %228 = sbr.rel (%p1324_p10) target bundleno = 895 (0x37f), region = 40  ;;  %s754_s16 = sshll.u32 (!%p1324_p10), %s1250_s15, 3 }
  0x4e   : > { %s231_s23 = scalar_lea.sflag (!%p1324_p10), [#allocation3], %s1250_s15  ;;  %s234_s27 = scalar_lea.vmem (!%p1324_p10), [#allocation2], %s754_s16 }
  0x52   : > { %1066 = dma.done.wait (%p1325_p4), %s231_s23, 128  }
  0x53   : > { %1068 = vsyncadd (%p1325_p4), %s231_s23, 4294967168  ;;  %p1326_p8 = scmp.eq.s32.totalorder %s1153_s22, 0 }
  0x55   : > { %1070 = dma.done.wait (%p1326_p8), [#allocation6], 4096   ;;  %p1327_p7 = pmov %p1326_p8 }
  0x56   : > { %v270_v0 = vld [vmem:[%s234_s27] sm:$0xff]  ;;  %v892_v4 = vld [vmem:[#allocation5 + $0x64] ss:$8 sps:$4 sm:$0xff]   ;;  %v894_v5 = vld [vmem:[#allocation5 + $0x60] ss:$8 sps:$4 sm:$0xff]   ;;  %v1100_v14 = vmov 0   ;;  %v303_v29 = vlaneseq }
  0x57   : > { %1072 = vsyncadd (%p1327_p7), [#allocation6], 4294963200  ;;  %v288_v1 = vmul.f32 %v270_v0, %v270_v0  ;;  %v889_v2 = vld [vmem:[#allocation5 + $0x74] ss:$8 sps:$4 sm:$0xff]   ;;  %v891_v3 = vld [vmem:[#allocation5 + $0x70] ss:$8 sps:$4 sm:$0xff]   ;;  %425 = vmatprep.mubr.bf16.mxu0 %v1100_v14 }
  0x58   : > { %393 = vmatprep.subr.bf16.mxu0 %v889_v2  ;;  %v895_v6 = vld [vmem:[#allocation5 + $0x54] ss:$8 sps:$4 sm:$0xff]   ;;  %v897_v7 = vld [vmem:[#allocation5 + $0x50] ss:$8 sps:$4 sm:$0xff]   ;;  %v898_v8 = vld [vmem:[#allocation5 + $0x44] ss:$8 sps:$4 sm:$0xff]  }
  0x59   : > { %289 = vadd.xlane.f32.xlu0 %v288_v1  ;;  %394 = vmatpush1.bf16.msra.mxu0 %v891_v3  ;;  %v900_v9 = vld [vmem:[#allocation5 + $0x40] ss:$8 sps:$4 sm:$0xff]   ;;  %v901_v10 = vld [vmem:[#allocation5 + $0x34] ss:$8 sps:$4 sm:$0xff]   ;;  %v903_v11 = vld [vmem:[#allocation5 + $0x30] ss:$8 sps:$4 sm:$0xff]  }
  0x5a   : > { %395 = vmatprep.subr.bf16.mxu0 %v892_v4  ;;  %v904_v12 = vld [vmem:[#allocation5 + $0x24] ss:$8 sps:$4 sm:$0xff]   ;;  %v906_v13 = vld [vmem:[#allocation5 + $0x20] ss:$8 sps:$4 sm:$0xff]   ;;  %v907_v15 = vld [vmem:[#allocation5 + $0x14] ss:$8 sps:$4 sm:$0xff]  }
  0x5b   : > { %v909_v16 = vld [vmem:[#allocation5 + $0x10] ss:$8 sps:$4 sm:$0xff]   ;;  %v910_v17 = vld [vmem:[#allocation5 + $0x4] ss:$8 sps:$4 sm:$0xff]   ;;  %v912_v18 = vld [vmem:[#allocation5] ss:$8 sps:$4 sm:$0xff]  }
  0x5c   : > { %v304_v30 = vshrl.u32 %v303_v29, 7  ;;  %v287_v32 = vld [vmem:[%s1309_s2] sm:$0x3]  ;;  %v913_v55 = vld [vmem:[#allocation7 + $0x78] sm:$0xff]   ;;  %v917_v59 = vld [vmem:[#allocation7 + $0x68] sm:$0xff]   ;;  %s792_s13 = sshll.u32 %s1153_s22, 7 }
  0x5d   : > { %396 = vmatpush1.bf16.msra.mxu0 %v894_v5  ;;  %v914_v56 = vld [vmem:[#allocation7 + $0x38] sm:$0xff]   ;;  %795 = vmatprep.subr.bf16.mxu1 %v913_v55  ;;  %v915_v57 = vld [vmem:[#allocation7 + $0x70] sm:$0xff]   ;;  %v918_v60 = vld [vmem:[#allocation7 + $0x28] sm:$0xff]   ;;  %s268_s14 = scalar_lea.vmem [#allocation8], %s754_s16  ;;  %s655_s29 = scalar_lea.hbm %s1312_s5, %s792_s13 }
  0x5e   : > { %397 = vmatprep.subr.bf16.mxu0 %v895_v6  ;;  %v305_v31 = vsub.s32 0, %v304_v30  ;;  %v309_v33 = vsub.s32 1, %v304_v30  ;;  %796 = vmatpush3.bf16.msra.mxu1 %v914_v56  ;;  %v916_v58 = vld [vmem:[#allocation7 + $0x30] sm:$0xff]   ;;  %v919_v61 = vld [vmem:[#allocation7 + $0x60] sm:$0xff]   ;;  %v921_v63 = vld [vmem:[#allocation7 + $0x58] sm:$0xff]   ;;  %s657_s6 = sshll.u32 %s268_s14, 4  ;;  %s658_s6 = int_to_ptr.vmem [resolvable:$true] %s657_s6 }
  0x5f   : > { %797 = vmatprep.subr.bf16.mxu1 %v915_v57  ;;  %v920_v62 = vld [vmem:[#allocation7 + $0x20] sm:$0xff]   ;;  %v923_v1 = vld [vmem:[#allocation7 + $0x50] sm:$0xff]   ;;  %v925_v3 = vld [vmem:[#allocation7 + $0x48] sm:$0xff]   ;;  %s644_s9 = scalar_lea.sflag [#allocation4], %s1250_s15  ;;  %s1023_s11 = scalar_lea.vmem %s658_s6, 128 }
  0x60   : > { %v306_v34 = vrot.slane %v287_v32, %v305_v31  ;;  %v310_v35 = vrot.slane %v287_v32, %v309_v33  ;;  %v924_v2 = vld [vmem:[#allocation7 + $0x10] sm:$0xff]   ;;  %v926_v4 = vld [vmem:[#allocation7 + $0x8] sm:$0xff]   ;;  %v927_v5 = vld [vmem:[#allocation7 + $0x40] sm:$0xff]   ;;  %p1024_p11 = scmp.ne.s32.totalorder %s658_s6, %s1023_s11  ;;  %p1328_p0 = scmp.ne.s32.totalorder %s1322_s30, 0 }
  0x61   : > { %398 = vmatpush1.bf16.msra.mxu0 %v897_v7  ;;  %v928_v6 = vld [vmem:[#allocation7] sm:$0xff]   ;;  %s1101_s23 = smov [#allocation8]  }
  0x62   : > { %399 = vmatprep.subr.bf16.mxu0 %v898_v8  ;;  %798 = vmatpush3.bf16.msra.mxu1 %v916_v58  ;;  %p1025_p1 = pnand %p1024_p11, %p1328_p0  ;;  %s1027_s22 = sshll.u32 %s1101_s23, 4  ;;  %s1028_s22 = int_to_ptr.vmem [resolvable:$false] %s1027_s22 }
  0x63   : > { %799 = vmatprep.subr.bf16.mxu1 %v917_v59  ;;  %s1029_s16 = scalar_lea.vmem %s1028_s22, 256  ;;  %p1030_p6 = scmp.lt.s32.totalorder %s658_s6, %s1028_s22 }
  0x64   : > { %p1026_p2 = pneg %p1025_p1  ;;  %p1031_p12 = scmp.lt.s32.totalorder %s1029_s16, %s1023_s11 }
  0x65   : > { %400 = vmatpush1.bf16.msra.mxu0 %v900_v9 }
  0x66   : > { %401 = vmatprep.subr.bf16.mxu0 %v901_v10  ;;  %800 = vmatpush3.bf16.msra.mxu1 %v918_v60  ;;  %p1032_p3 = por %p1031_p12, %p1030_p6 }
  0x67   : > { %801 = vmatprep.subr.bf16.mxu1 %v919_v61 }
  0x68   : > { %p1033_p9 = pnand %p1032_p3, %p1026_p2 }
  0x69   : > { %402 = vmatpush1.bf16.msra.mxu0 %v903_v11 }
  0x6a   : > { %403 = vmatprep.subr.bf16.mxu0 %v904_v12  ;;  %802 = vmatpush3.bf16.msra.mxu1 %v920_v62 }
  0x6b   : > { %803 = vmatprep.subr.bf16.mxu1 %v921_v63 }
  0x6d   : > { %404 = vmatpush1.bf16.msra.mxu0 %v906_v13 }
  0x6e   : > { %405 = vmatprep.subr.bf16.mxu0 %v907_v15 }
  0x71   : > { %406 = vmatpush1.bf16.msra.mxu0 %v909_v16 }
  0x72   : > { %407 = vmatprep.subr.bf16.mxu0 %v910_v17 }
  0x75   : > { %408 = vmatpush1.bf16.msra.mxu0 %v912_v18 }
  0xe2   : > { %v290_v19 = vpop.xlane.xlu0 %289 }
  0xe3   : > { %929 = vrsqrt.f32 %v290_v19  ;;  %vm293_vm0 = vcmp.eq.f32.partialorder %v290_v19, inf  ;;  %v296_v22 = vand.u32 2147483648, %v290_v19  ;;  %vm295_vm1 = vcmp.eq.f32.partialorder %v290_v19, 0.0 }
  0xf0   : > { %v930_v20 = vpop.eup %929 }
  0xf1   : > { %v292_v21 = vmul.f32 %v930_v20, %v290_v19  ;;  %v774_v20 = vld [vmem:[%s1311_s4] ss:$0 sm:$0xff] }
  0xf3   : > { %v294_v23 = vsel %vm293_vm0, %v290_v19, %v292_v21 }
  0xf4   : > { %v297_v24 = vsel %vm295_vm1, %v296_v22, %v294_v23 }
  0xf5   : > { %v298_v25 = vadd.f32 0.0001, %v297_v24 }
  0xf7   : > { %931 = vrcp.f32 %v298_v25 }
 0x104   : > { %v932_v26 = vpop.eup %931 }
 0x105   : > { %v300_v27 = vmul.f32 %v932_v26, %v270_v0  ;;  %v922_v0 = vld [vmem:[#allocation7 + $0x18] sm:$0xff]  }
 0x106   : > { %804 = vmatpush3.bf16.msra.mxu1 %v922_v0 }
 0x107   : > { %v301_v28 = vpack.c.bf16 %v300_v27, %v300_v27  ;;  %805 = vmatprep.subr.bf16.mxu1 %v923_v1 }
 0x109   : > { %426 = vmatmul.mubr.bf16.vlgmr.msra.gmra.mxu0 %v301_v28 }
 0x10a   : > { %806 = vmatpush3.bf16.msra.mxu1 %v924_v2 }
 0x10b   : > { %807 = vmatprep.subr.bf16.mxu1 %v925_v3 }
 0x10e   : > { %808 = vmatpush3.bf16.msra.mxu1 %v926_v4 }
 0x10f   : > { %809 = vmatprep.subr.bf16.mxu1 %v927_v5 }
 0x112   : > { %810 = vmatpush3.bf16.msra.mxu1 %v928_v6 }
 0x1c9   : > { %v427_v36 = vpop.f32.mrf.mxu0 }
 0x1ca   : > { %v428_v37 = vadd.f32 %v427_v36, %v306_v34 }
 0x1cb   : > { %v429_v38 = vpop.f32.mrf.mxu0 }
 0x1cc   : > { %v436_v39 = vmul.f32 0.70710677, %v428_v37  ;;  %v430_v40 = vadd.f32 %v429_v38, %v310_v35  ;;  %v434_v45 = vmul.f32 0.5, %v428_v37 }
 0x1cd   : > { %v431_v41 = vpop.f32.mrf.mxu0 }
 0x1ce   : > { %933 = verf.f32 %v436_v39  ;;  %v437_v42 = vmul.f32 0.70710677, %v430_v40  ;;  %v435_v49 = vmul.f32 0.5, %v430_v40 }
 0x1cf   : > { %v432_v43 = vpop.f32.mrf.mxu0 }
 0x1d0   : > { %935 = verf.f32 %v437_v42 }
 0x1db   : > { %v934_v44 = vpop.eup %933 }
 0x1dc   : > { %v440_v46 = vadd.f32 1.0, %v934_v44 }
 0x1dd   : > { %v936_v47 = vpop.eup %935 }
 0x1de   : > { %v442_v48 = vmul.f32 %v440_v46, %v434_v45  ;;  %v441_v50 = vadd.f32 1.0, %v936_v47 }
 0x1e0   : > { %v443_v51 = vmul.f32 %v441_v50, %v435_v49  ;;  %v477_v52 = vmul.f32 %v442_v48, %v442_v48 }
 0x1e2   : > { %v478_v53 = vmul.f32 %v443_v51, %v443_v51 }
 0x1e4   : > { %v479_v54 = vadd.f32 %v478_v53, %v477_v52 }
 0x1e6   : > { %480 = vadd.xlane.f32.xlu0 %v479_v54 }
 0x26f   : > { %v481_v7 = vpop.xlane.xlu0 %480 }
 0x270   : > { %937 = vrsqrt.f32 %v481_v7  ;;  %vm484_vm2 = vcmp.eq.f32.partialorder %v481_v7, inf  ;;  %v487_v10 = vand.u32 2147483648, %v481_v7  ;;  %vm486_vm3 = vcmp.eq.f32.partialorder %v481_v7, 0.0 }
 0x27d   : > { %v938_v8 = vpop.eup %937 }
 0x27e   : > { %v483_v9 = vmul.f32 %v938_v8, %v481_v7 }
 0x280   : > { %v485_v11 = vsel %vm484_vm2, %v481_v7, %v483_v9 }
 0x281   : > { %v488_v12 = vsel %vm486_vm3, %v487_v10, %v485_v11 }
 0x282   : > { %v489_v13 = vadd.f32 0.0001, %v488_v12 }
 0x284   : > { %939 = vrcp.f32 %v489_v13 }
 0x291   : > { %v940_v14 = vpop.eup %939 }
 0x292   : > { %v492_v15 = vmul.f32 %v940_v14, %v443_v51  ;;  %v491_v16 = vmul.f32 %v940_v14, %v442_v48 }
 0x294   : > { %v494_v17 = vpack.c.bf16 %v492_v15, %v492_v15  ;;  %v493_v18 = vpack.c.bf16 %v491_v16, %v491_v16 }
 0x296   : > { %629 = vmatprep.mubr.bf16.mxu1 %v494_v17 }
 0x297   : > { %630 = vmatmul.mubr.bf16.vlgmr.msra.gmra.mxu1 %v493_v18 }
 0x357   : > { %v811_v19 = vpop.f32.mrf.mxu1 }
 0x359   : > { %v812_v21 = vpop.f32.mrf.mxu1 }
 0x35a   : > { %v813_v22 = vadd.f32 %v812_v21, %v811_v19 }
 0x35b   : > { %v814_v23 = vpop.f32.mrf.mxu1 }
 0x35c   : > { %v632_v24 = vadd.f32 %v813_v22, %v774_v20 }
 0x35d   : > { %v815_v25 = vpop.f32.mrf.mxu1 }
 0x35e   : > { %v638_v26 = vmul.f32 0.70710677, %v632_v24  ;;  %v637_v28 = vmul.f32 0.5, %v632_v24 }
 0x360   : > { %941 = verf.f32 %v638_v26 }
 0x36d   : > { %v942_v27 = vpop.eup %941 }
 0x36e   : > { %v640_v29 = vadd.f32 1.0, %v942_v27 }
 0x370   : > { %v641_v30 = vmul.f32 %v640_v29, %v637_v28 }
 0x372   : > { %642 = vst [vmem:[%s268_s14] sm:$0xff] %v641_v30 }
 0x373   : > { %1036 = shalt.err (!%p1033_p9)
}
 0x374   : > { %s1037_s27 = scalar_lea.hbm %s655_s29, 128  ;;  %s1041_s26 = scalar_lea.hbm %s1312_s5, 256 }
 0x375   : > { %p1038_p13 = scmp.ne.s32.totalorder %s655_s29, %s1037_s27  ;;  %p1042_p4 = scmp.lt.s32.totalorder %s655_s29, %s1312_s5 }
 0x376   : > { %p1043_p8 = scmp.lt.s32.totalorder %s1041_s26, %s1037_s27 }
 0x377   : > { %p1039_p5 = pnand %p1038_p13, %p1328_p0 }
 0x378   : > { %p1044_p7 = por %p1043_p8, %p1042_p4 }
 0x379   : > { %p1040_p10 = pneg %p1039_p5 }
 0x37b   : > { %p1045_p11 = pnand %p1044_p7, %p1040_p10 }
 0x37d   : > { %1048 = shalt.err (!%p1045_p11)
}
 0x37e   : > { %827 = dma.vmem_to_hbm [thread:$0]  (%p1328_p0), %s658_s6, 128, %s655_s29, %s644_s9  }
 0x37f PF: > { %s669_s13 = sand.u32 1, %s1079_s18   ;;  %p1329_p1 = scmp.ne.s32.totalorder %s1318_s25, 0 }
 0x380   : > { %p1330_p2 = scmp.ge.s32.totalorder %s1091_s21, 2  ;;  %s670_s14 = scalar_lea.sflag [#allocation4], %s669_s13 }
 0x382   : > { %p841_p6 = pnand %p1330_p2, %p1329_p1 }
 0x384   : > { %p842_p12 = pneg %p841_p6 }
 0x386   : > { %1074 = dma.done.wait (%p842_p12), %s670_s14, 128  }
 0x387   : > { %1076 = vsyncadd (%p842_p12), %s670_s14, 4294967168  ;;  %p19_p3 = scmp.ge.s32.totalorder %s1204_s17, 4   ;;  %s1331_s18 = smov %s1083_s19 }
 0x388   : > { %s1332_s19 = smov %s1087_s20  ;;  %s1333_s20 = smov %s1213_s28 }
 0x389   : > { %s1334_s21 = smov %s1204_s17  ;;  %21 = sbr.rel (!%p19_p3) target bundleno = 6 (0x6), region = 93 }
 0x38e   :  { %675 = vsyncpa [#allocation3], 1 }
 0x38f   :  { %677 = vsyncpa [#allocation3 + $0x1], 1 }
 0x390   :  { %678 = vsyncpa [#allocation6], 1 }
 0x391   :  { %679 = vsyncpa [#allocation4], 1 }
 0x392   :  { %681 = vsyncpa [#allocation4 + $0x1], 1 }

// kernel: tpu_custom_call.1
= control target key start
LH: loop header
LB: loop body
LE: loop exit
PB: predicated region body
PF: predicated region fallthrough
CT: control target
= control target key end

     0   :  { %10 = vsyncpa [#allocation3], 0  ;;  %s1307_s0 = inlined_call_operand.hbm [shape: f32[16,128], index: 0, kind: input, shape index: {}]   ;;  %s1308_s1 = inlined_call_operand.hbm [shape: bf16[128,256], index: 1, kind: input, shape index: {}]   ;;  %s1309_s2 = inlined_call_operand.vmem [shape: f32[1,256], index: 2, kind: input, shape index: {}]   ;;  %s1310_s3 = inlined_call_operand.hbm [shape: bf16[256,128], index: 3, kind: input, shape index: {}]   ;;  %s1311_s4 = inlined_call_operand.vmem [shape: f32[1,128], index: 4, kind: input, shape index: {}]   ;;  %s1312_s5 = inlined_call_operand.hbm [shape: f32[16,128], index: 5, kind: output, shape index: {}]  }
   0x1   :  { %12 = vsyncpa [#allocation3 + $0x1], 0 }
   0x2   :  { %13 = vsyncpa [#allocation6], 0 }
   0x3   :  { %14 = vsyncpa [#allocation4], 0 }
   0x4   :  { %16 = vsyncpa [#allocation4 + $0x1], 0  ;;  %s1132_s18 = smov 0   ;;  %s1134_s19 = smov 0  }
   0x5   :  { %s1136_s20 = smov 0   ;;  %s1138_s21 = smov 0  }
   0x6 LB: > { %s1153_s22 = sadd.s32 4294967295, %s1091_s21   ;;  %s746_s23 = sadd.s32 4294967294, %s1091_s21   ;;  %s1091_s21 = sphi %s1138_s21, %s1334_s21   ;;  %s1087_s20 = sphi %s1136_s20, %s1333_s20   ;;  %s1083_s19 = sphi %s1134_s19, %s1332_s19   ;;  %s1079_s18 = sphi %s1132_s18, %s1331_s18  }
   0x7   : > { %p42_p0 = scmp.ne.s32.totalorder %s1083_s19, %s1079_s18  ;;  %p1313_p1 = scmp.eq.s32.totalorder %s1153_s22, 0 }
   0x8   : > { %p156_p3 = scmp.eq.s32.totalorder %s746_s23, 1  ;;  %p747_p5 = scmp.ge.s32.totalorder %s1091_s21, 1 }
   0x9   : > { %p1162_p4 = por %p1313_p1, %p42_p0  ;;  %p163_p7 = scmp.lt.s32.totalorder %s1091_s21, 3 }
   0xa   : > { %p1167_p6 = por %p156_p3, %p42_p0  ;;  %s1093_s27 = smov [#allocation5]  }
   0xb   : > { %s1317_s24 = scalar_select %p1162_p4, 1, 0 }
   0xc   : > { %s1318_s25 = scalar_select %p1167_p6, 1, 0 }
   0xd   : > { %p1172_p8 = pnand %p747_p5, %p163_p7  ;;  %s175_s28 = sshll.u32 %s1093_s27, 4  ;;  %s176_s28 = int_to_ptr.vmem [resolvable:$true] %s175_s28 }
   0xe   : > { %s1094_s30 = smov [#allocation7]   ;;  %s954_s7 = scalar_lea.vmem %s176_s28, 2048 }
   0xf   : > { %s1319_s26 = scalar_select %p1172_p8, 1, 0 }
  0x10   : > { %p829_p9 = pneg %p1172_p8  ;;  %s191_s6 = sshll.u32 %s1094_s30, 4  ;;  %s192_s6 = int_to_ptr.vmem [resolvable:$true] %s191_s6 }
  0x11   : > { %p955_p13 = scmp.ne.s32.totalorder %s176_s28, %s954_s7  ;;  %p962_p5 = scmp.lt.s32.totalorder %s176_s28, %s176_s28 }
  0x12   : > { %p1181_p11 = pnand %p829_p9, %p1313_p1  ;;  %p963_p7 = scmp.lt.s32.totalorder %s954_s7, %s954_s7 }
  0x14   : > { %p945_p12 = pneg %p1181_p11  ;;  %p964_p10 = por %p963_p7, %p962_p5 }
  0x16   : > { %p957_p0 = pnand %p955_p13, %p945_p12 }
  0x18   : > { %p958_p3 = pneg %p957_p0 }
  0x1a   : > { %p965_p9 = pnand %p964_p10, %p958_p3 }
  0x1c   : > { %968 = shalt.err (!%p965_p9)
}
  0x1d   : > { %s1095_s8 = smov 128   ;;  %s1096_s9 = smov 8  }
  0x1e   : > { %832 = dma.hbm_to_vmem [thread:$0]  (!%p1181_p11), %s1308_s1, 2048, %s176_s28, [#allocation6], %s1095_s8, %s1095_s8, %s1096_s9  }
  0x1f   : > { %s980_s12 = scalar_lea.vmem %s192_s6, 2048  ;;  %p988_p2 = scmp.lt.s32.totalorder %s192_s6, %s192_s6 }
  0x20   : > { %p981_p1 = scmp.ne.s32.totalorder %s192_s6, %s980_s12  ;;  %p989_p6 = scmp.lt.s32.totalorder %s980_s12, %s980_s12 }
  0x22   : > { %p983_p13 = pnand %p981_p1, %p945_p12  ;;  %p990_p5 = por %p989_p6, %p988_p2 }
  0x24   : > { %p984_p0 = pneg %p983_p13 }
  0x26   : > { %p991_p10 = pnand %p990_p5, %p984_p0 }
  0x28   : > { %994 = shalt.err (!%p991_p10)
}
  0x29   : > { %s1097_s13 = smov 64   ;;  %s1098_s14 = smov 4  }
  0x2a   : > { %835 = dma.hbm_to_vmem [thread:$0]  (!%p1181_p11), %s1310_s3, 2048, %s192_s6, [#allocation6], %s1097_s13, %s1097_s13, %s1098_s14  }
  0x2b   : > { %s1204_s17 = sadd.s32 1, %s1091_s21   ;;  %s29_s27 = sadd.s32 1, %s1087_s20 }
  0x2c   : > { %s26_s23 = ssub.s32 %s1091_s21, %s1204_s17  ;;  %p36_p2 = scmp.ne.s32.totalorder %s1087_s20, %s1083_s19 }
  0x2d   : > { %p27_p1 = scmp.eq.s32.totalorder %s26_s23, 0  ;;  %p37_p6 = scmp.eq.s32.totalorder %s1091_s21, 0 }
  0x2e   : > { %p1321_p3 = scmp.eq.s32.totalorder %s1153_s22, 1  ;;  %p846_p9 = scmp.lt.s32.totalorder %s1091_s21, 2 }
  0x2f   : > { %s1213_s28 = scalar_select %p27_p1, %s1087_s20, %s29_s27  }
  0x30   : > { %p38_p12 = por %p37_p6, %p36_p2  ;;  %p1217_p7 = por %p1321_p3, %p36_p2 }
  0x31   : > { %s208_s29 = sand.u32 1, %s1087_s20   ;;  %s752_s6 = sshll.u32 %s1091_s21, 7 }
  0x32   : > { %s1322_s30 = scalar_select %p1217_p7, 1, 0 }
  0x33   : > { %s751_s7 = sshll.u32 %s208_s29, 3  ;;  %s1227_s10 = scalar_lea.hbm %s1307_s0, %s752_s6 }
  0x34   : > { %s212_s11 = scalar_lea.vmem [#allocation2], %s751_s7  ;;  %p1229_p11 = pnand %p846_p9, %p38_p12 }
  0x35   : > { %s219_s12 = sshll.u32 %s212_s11, 4  ;;  %s209_s14 = scalar_lea.sflag [#allocation3], %s208_s29  ;;  %s220_s12 = int_to_ptr.vmem [resolvable:$true] %s219_s12 }
  0x36   : > { %s995_s15 = scalar_lea.hbm %s1227_s10, 128  ;;  %p997_p0 = pneg %p1229_p11 }
  0x37   : > { %p996_p13 = scmp.ne.s32.totalorder %s1227_s10, %s995_s15  ;;  %s1000_s27 = scalar_lea.hbm %s1307_s0, 256 }
  0x38   : > { %p1001_p1 = scmp.lt.s32.totalorder %s1227_s10, %s1307_s0  ;;  %p1002_p2 = scmp.lt.s32.totalorder %s1000_s27, %s995_s15 }
  0x39   : > { %p998_p5 = pnand %p997_p0, %p996_p13 }
  0x3a   : > { %p1003_p6 = por %p1002_p2, %p1001_p1 }
  0x3b   : > { %p999_p10 = pneg %p998_p5 }
  0x3d   : > { %p1004_p12 = pnand %p1003_p6, %p999_p10 }
  0x3f   : > { %1007 = shalt.err (!%p1004_p12)
}
  0x40   : > { %s1008_s8 = scalar_lea.vmem %s220_s12, 128  ;;  %s1099_s29 = smov [#allocation2]  }
  0x41   : > { %p1009_p3 = scmp.ne.s32.totalorder %s220_s12, %s1008_s8  ;;  %s1013_s9 = sshll.u32 %s1099_s29, 4  ;;  %s1014_s9 = int_to_ptr.vmem [resolvable:$false] %s1013_s9 }
  0x42   : > { %s1015_s11 = scalar_lea.vmem %s1014_s9, 256  ;;  %p1016_p13 = scmp.lt.s32.totalorder %s220_s12, %s1014_s9 }
  0x43   : > { %p1011_p9 = pnand %p1009_p3, %p997_p0  ;;  %p1017_p5 = scmp.lt.s32.totalorder %s1015_s11, %s1008_s8 }
  0x45   : > { %p1012_p7 = pneg %p1011_p9  ;;  %p1018_p4 = por %p1017_p5, %p1016_p13 }
  0x47   : > { %p1019_p8 = pnand %p1018_p4, %p1012_p7 }
  0x49   : > { %1022 = shalt.err (!%p1019_p8)
}
  0x4a   : > { %839 = dma.hbm_to_vmem [thread:$0]  (!%p1229_p11), %s1227_s10, 128, %s220_s12, %s209_s14  }
  0x4b   : > { %p1324_p10 = scmp.ne.s32.totalorder %s1319_s26, 0 }
  0x4c   : > { %s1250_s15 = sand.u32 (!%p1324_p10), 1, %s1083_s19   ;;  %p1325_p4 = scmp.ne.s32.totalorder (!%p1324_p10), %s1317_s24, 0 }
  0x4d   : > { %228 = sbr.rel (%p1324_p10) target bundleno = 895 (0x37f), region = 40  ;;  %s754_s16 = sshll.u32 (!%p1324_p10), %s1250_s15, 3 }
  0x4e   : > { %s231_s23 = scalar_lea.sflag (!%p1324_p10), [#allocation3], %s1250_s15  ;;  %s234_s27 = scalar_lea.vmem (!%p1324_p10), [#allocation2], %s754_s16 }
  0x52   : > { %1066 = dma.done.wait (%p1325_p4), %s231_s23, 128  }
  0x53   : > { %1068 = vsyncadd (%p1325_p4), %s231_s23, 4294967168  ;;  %p1326_p8 = scmp.eq.s32.totalorder %s1153_s22, 0 }
  0x55   : > { %1070 = dma.done.wait (%p1326_p8), [#allocation6], 4096   ;;  %p1327_p7 = pmov %p1326_p8 }
  0x56   : > { %v270_v0 = vld [vmem:[%s234_s27] sm:$0xff]  ;;  %v892_v4 = vld [vmem:[#allocation5 + $0x64] ss:$8 sps:$4 sm:$0xff]   ;;  %v894_v5 = vld [vmem:[#allocation5 + $0x60] ss:$8 sps:$4 sm:$0xff]   ;;  %v1100_v14 = vmov 0   ;;  %v303_v29 = vlaneseq }
  0x57   : > { %1072 = vsyncadd (%p1327_p7), [#allocation6], 4294963200  ;;  %v288_v1 = vmul.f32 %v270_v0, %v270_v0  ;;  %v889_v2 = vld [vmem:[#allocation5 + $0x74] ss:$8 sps:$4 sm:$0xff]   ;;  %v891_v3 = vld [vmem:[#allocation5 + $0x70] ss:$8 sps:$4 sm:$0xff]   ;;  %425 = vmatprep.mubr.bf16.mxu0 %v1100_v14 }
  0x58   : > { %393 = vmatprep.subr.bf16.mxu0 %v889_v2  ;;  %v895_v6 = vld [vmem:[#allocation5 + $0x54] ss:$8 sps:$4 sm:$0xff]   ;;  %v897_v7 = vld [vmem:[#allocation5 + $0x50] ss:$8 sps:$4 sm:$0xff]   ;;  %v898_v8 = vld [vmem:[#allocation5 + $0x44] ss:$8 sps:$4 sm:$0xff]  }
  0x59   : > { %289 = vadd.xlane.f32.xlu0 %v288_v1  ;;  %394 = vmatpush1.bf16.msra.mxu0 %v891_v3  ;;  %v900_v9 = vld [vmem:[#allocation5 + $0x40] ss:$8 sps:$4 sm:$0xff]   ;;  %v901_v10 = vld [vmem:[#allocation5 + $0x34] ss:$8 sps:$4 sm:$0xff]   ;;  %v903_v11 = vld [vmem:[#allocation5 + $0x30] ss:$8 sps:$4 sm:$0xff]  }
  0x5a   : > { %395 = vmatprep.subr.bf16.mxu0 %v892_v4  ;;  %v904_v12 = vld [vmem:[#allocation5 + $0x24] ss:$8 sps:$4 sm:$0xff]   ;;  %v906_v13 = vld [vmem:[#allocation5 + $0x20] ss:$8 sps:$4 sm:$0xff]   ;;  %v907_v15 = vld [vmem:[#allocation5 + $0x14] ss:$8 sps:$4 sm:$0xff]  }
  0x5b   : > { %v909_v16 = vld [vmem:[#allocation5 + $0x10] ss:$8 sps:$4 sm:$0xff]   ;;  %v910_v17 = vld [vmem:[#allocation5 + $0x4] ss:$8 sps:$4 sm:$0xff]   ;;  %v912_v18 = vld [vmem:[#allocation5] ss:$8 sps:$4 sm:$0xff]  }
  0x5c   : > { %v304_v30 = vshrl.u32 %v303_v29, 7  ;;  %v287_v32 = vld [vmem:[%s1309_s2] sm:$0x3]  ;;  %v913_v55 = vld [vmem:[#allocation7 + $0x78] sm:$0xff]   ;;  %v917_v59 = vld [vmem:[#allocation7 + $0x68] sm:$0xff]   ;;  %s792_s13 = sshll.u32 %s1153_s22, 7 }
  0x5d   : > { %396 = vmatpush1.bf16.msra.mxu0 %v894_v5  ;;  %v914_v56 = vld [vmem:[#allocation7 + $0x38] sm:$0xff]   ;;  %795 = vmatprep.subr.bf16.mxu1 %v913_v55  ;;  %v915_v57 = vld [vmem:[#allocation7 + $0x70] sm:$0xff]   ;;  %v918_v60 = vld [vmem:[#allocation7 + $0x28] sm:$0xff]   ;;  %s268_s14 = scalar_lea.vmem [#allocation8], %s754_s16  ;;  %s655_s29 = scalar_lea.hbm %s1312_s5, %s792_s13 }
  0x5e   : > { %397 = vmatprep.subr.bf16.mxu0 %v895_v6  ;;  %v305_v31 = vsub.s32 0, %v304_v30  ;;  %v309_v33 = vsub.s32 1, %v304_v30  ;;  %796 = vmatpush3.bf16.msra.mxu1 %v914_v56  ;;  %v916_v58 = vld [vmem:[#allocation7 + $0x30] sm:$0xff]   ;;  %v919_v61 = vld [vmem:[#allocation7 + $0x60] sm:$0xff]   ;;  %v921_v63 = vld [vmem:[#allocation7 + $0x58] sm:$0xff]   ;;  %s657_s6 = sshll.u32 %s268_s14, 4  ;;  %s658_s6 = int_to_ptr.vmem [resolvable:$true] %s657_s6 }
  0x5f   : > { %797 = vmatprep.subr.bf16.mxu1 %v915_v57  ;;  %v920_v62 = vld [vmem:[#allocation7 + $0x20] sm:$0xff]   ;;  %v923_v1 = vld [vmem:[#allocation7 + $0x50] sm:$0xff]   ;;  %v925_v3 = vld [vmem:[#allocation7 + $0x48] sm:$0xff]   ;;  %s644_s9 = scalar_lea.sflag [#allocation4], %s1250_s15  ;;  %s1023_s11 = scalar_lea.vmem %s658_s6, 128 }
  0x60   : > { %v306_v34 = vrot.slane %v287_v32, %v305_v31  ;;  %v310_v35 = vrot.slane %v287_v32, %v309_v33  ;;  %v924_v2 = vld [vmem:[#allocation7 + $0x10] sm:$0xff]   ;;  %v926_v4 = vld [vmem:[#allocation7 + $0x8] sm:$0xff]   ;;  %v927_v5 = vld [vmem:[#allocation7 + $0x40] sm:$0xff]   ;;  %p1024_p11 = scmp.ne.s32.totalorder %s658_s6, %s1023_s11  ;;  %p1328_p0 = scmp.ne.s32.totalorder %s1322_s30, 0 }
  0x61   : > { %398 = vmatpush1.bf16.msra.mxu0 %v897_v7  ;;  %v928_v6 = vld [vmem:[#allocation7] sm:$0xff]   ;;  %s1101_s23 = smov [#allocation8]  }
  0x62   : > { %399 = vmatprep.subr.bf16.mxu0 %v898_v8  ;;  %798 = vmatpush3.bf16.msra.mxu1 %v916_v58  ;;  %p1025_p1 = pnand %p1024_p11, %p1328_p0  ;;  %s1027_s22 = sshll.u32 %s1101_s23, 4  ;;  %s1028_s22 = int_to_ptr.vmem [resolvable:$false] %s1027_s22 }
  0x63   : > { %799 = vmatprep.subr.bf16.mxu1 %v917_v59  ;;  %s1029_s16 = scalar_lea.vmem %s1028_s22, 256  ;;  %p1030_p6 = scmp.lt.s32.totalorder %s658_s6, %s1028_s22 }
  0x64   : > { %p1026_p2 = pneg %p1025_p1  ;;  %p1031_p12 = scmp.lt.s32.totalorder %s1029_s16, %s1023_s11 }
  0x65   : > { %400 = vmatpush1.bf16.msra.mxu0 %v900_v9 }
  0x66   : > { %401 = vmatprep.subr.bf16.mxu0 %v901_v10  ;;  %800 = vmatpush3.bf16.msra.mxu1 %v918_v60  ;;  %p1032_p3 = por %p1031_p12, %p1030_p6 }
  0x67   : > { %801 = vmatprep.subr.bf16.mxu1 %v919_v61 }
  0x68   : > { %p1033_p9 = pnand %p1032_p3, %p1026_p2 }
  0x69   : > { %402 = vmatpush1.bf16.msra.mxu0 %v903_v11 }
  0x6a   : > { %403 = vmatprep.subr.bf16.mxu0 %v904_v12  ;;  %802 = vmatpush3.bf16.msra.mxu1 %v920_v62 }
  0x6b   : > { %803 = vmatprep.subr.bf16.mxu1 %v921_v63 }
  0x6d   : > { %404 = vmatpush1.bf16.msra.mxu0 %v906_v13 }
  0x6e   : > { %405 = vmatprep.subr.bf16.mxu0 %v907_v15 }
  0x71   : > { %406 = vmatpush1.bf16.msra.mxu0 %v909_v16 }
  0x72   : > { %407 = vmatprep.subr.bf16.mxu0 %v910_v17 }
  0x75   : > { %408 = vmatpush1.bf16.msra.mxu0 %v912_v18 }
  0xe2   : > { %v290_v19 = vpop.xlane.xlu0 %289 }
  0xe3   : > { %929 = vrsqrt.f32 %v290_v19  ;;  %vm293_vm0 = vcmp.eq.f32.partialorder %v290_v19, inf  ;;  %v296_v22 = vand.u32 2147483648, %v290_v19  ;;  %vm295_vm1 = vcmp.eq.f32.partialorder %v290_v19, 0.0 }
  0xf0   : > { %v930_v20 = vpop.eup %929 }
  0xf1   : > { %v292_v21 = vmul.f32 %v930_v20, %v290_v19  ;;  %v774_v20 = vld [vmem:[%s1311_s4] ss:$0 sm:$0xff] }
  0xf3   : > { %v294_v23 = vsel %vm293_vm0, %v290_v19, %v292_v21 }
  0xf4   : > { %v297_v24 = vsel %vm295_vm1, %v296_v22, %v294_v23 }
  0xf5   : > { %v298_v25 = vadd.f32 0.0001, %v297_v24 }
  0xf7   : > { %931 = vrcp.f32 %v298_v25 }
 0x104   : > { %v932_v26 = vpop.eup %931 }
 0x105   : > { %v300_v27 = vmul.f32 %v932_v26, %v270_v0  ;;  %v922_v0 = vld [vmem:[#allocation7 + $0x18] sm:$0xff]  }
 0x106   : > { %804 = vmatpush3.bf16.msra.mxu1 %v922_v0 }
 0x107   : > { %v301_v28 = vpack.c.bf16 %v300_v27, %v300_v27  ;;  %805 = vmatprep.subr.bf16.mxu1 %v923_v1 }
 0x109   : > { %426 = vmatmul.mubr.bf16.vlgmr.msra.gmra.mxu0 %v301_v28 }
 0x10a   : > { %806 = vmatpush3.bf16.msra.mxu1 %v924_v2 }
 0x10b   : > { %807 = vmatprep.subr.bf16.mxu1 %v925_v3 }
 0x10e   : > { %808 = vmatpush3.bf16.msra.mxu1 %v926_v4 }
 0x10f   : > { %809 = vmatprep.subr.bf16.mxu1 %v927_v5 }
 0x112   : > { %810 = vmatpush3.bf16.msra.mxu1 %v928_v6 }
 0x1c9   : > { %v427_v36 = vpop.f32.mrf.mxu0 }
 0x1ca   : > { %v428_v37 = vadd.f32 %v427_v36, %v306_v34 }
 0x1cb   : > { %v429_v38 = vpop.f32.mrf.mxu0 }
 0x1cc   : > { %v436_v39 = vmul.f32 0.70710677, %v428_v37  ;;  %v430_v40 = vadd.f32 %v429_v38, %v310_v35  ;;  %v434_v45 = vmul.f32 0.5, %v428_v37 }
 0x1cd   : > { %v431_v41 = vpop.f32.mrf.mxu0 }
 0x1ce   : > { %933 = verf.f32 %v436_v39  ;;  %v437_v42 = vmul.f32 0.70710677, %v430_v40  ;;  %v435_v49 = vmul.f32 0.5, %v430_v40 }
 0x1cf   : > { %v432_v43 = vpop.f32.mrf.mxu0 }
 0x1d0   : > { %935 = verf.f32 %v437_v42 }
 0x1db   : > { %v934_v44 = vpop.eup %933 }
 0x1dc   : > { %v440_v46 = vadd.f32 1.0, %v934_v44 }
 0x1dd   : > { %v936_v47 = vpop.eup %935 }
 0x1de   : > { %v442_v48 = vmul.f32 %v440_v46, %v434_v45  ;;  %v441_v50 = vadd.f32 1.0, %v936_v47 }
 0x1e0   : > { %v443_v51 = vmul.f32 %v441_v50, %v435_v49  ;;  %v477_v52 = vmul.f32 %v442_v48, %v442_v48 }
 0x1e2   : > { %v478_v53 = vmul.f32 %v443_v51, %v443_v51 }
 0x1e4   : > { %v479_v54 = vadd.f32 %v478_v53, %v477_v52 }
 0x1e6   : > { %480 = vadd.xlane.f32.xlu0 %v479_v54 }
 0x26f   : > { %v481_v7 = vpop.xlane.xlu0 %480 }
 0x270   : > { %937 = vrsqrt.f32 %v481_v7  ;;  %vm484_vm2 = vcmp.eq.f32.partialorder %v481_v7, inf  ;;  %v487_v10 = vand.u32 2147483648, %v481_v7  ;;  %vm486_vm3 = vcmp.eq.f32.partialorder %v481_v7, 0.0 }
 0x27d   : > { %v938_v8 = vpop.eup %937 }
 0x27e   : > { %v483_v9 = vmul.f32 %v938_v8, %v481_v7 }
 0x280   : > { %v485_v11 = vsel %vm484_vm2, %v481_v7, %v483_v9 }
 0x281   : > { %v488_v12 = vsel %vm486_vm3, %v487_v10, %v485_v11 }
 0x282   : > { %v489_v13 = vadd.f32 0.0001, %v488_v12 }
 0x284   : > { %939 = vrcp.f32 %v489_v13 }
 0x291   : > { %v940_v14 = vpop.eup %939 }
 0x292   : > { %v492_v15 = vmul.f32 %v940_v14, %v443_v51  ;;  %v491_v16 = vmul.f32 %v940_v14, %v442_v48 }
 0x294   : > { %v494_v17 = vpack.c.bf16 %v492_v15, %v492_v15  ;;  %v493_v18 = vpack.c.bf16 %v491_v16, %v491_v16 }
 0x296   : > { %629 = vmatprep.mubr.bf16.mxu1 %v494_v17 }
 0x297   : > { %630 = vmatmul.mubr.bf16.vlgmr.msra.gmra.mxu1 %v493_v18 }
 0x357   : > { %v811_v19 = vpop.f32.mrf.mxu1 }
 0x359   : > { %v812_v21 = vpop.f32.mrf.mxu1 }
 0x35a   : > { %v813_v22 = vadd.f32 %v812_v21, %v811_v19 }
 0x35b   : > { %v814_v23 = vpop.f32.mrf.mxu1 }
 0x35c   : > { %v632_v24 = vadd.f32 %v813_v22, %v774_v20 }
 0x35d   : > { %v815_v25 = vpop.f32.mrf.mxu1 }
 0x35e   : > { %v638_v26 = vmul.f32 0.70710677, %v632_v24  ;;  %v637_v28 = vmul.f32 0.5, %v632_v24 }
 0x360   : > { %941 = verf.f32 %v638_v26 }
 0x36d   : > { %v942_v27 = vpop.eup %941 }
 0x36e   : > { %v640_v29 = vadd.f32 1.0, %v942_v27 }
 0x370   : > { %v641_v30 = vmul.f32 %v640_v29, %v637_v28 }
 0x372   : > { %642 = vst [vmem:[%s268_s14] sm:$0xff] %v641_v30 }
 0x373   : > { %1036 = shalt.err (!%p1033_p9)
}
 0x374   : > { %s1037_s27 = scalar_lea.hbm %s655_s29, 128  ;;  %s1041_s26 = scalar_lea.hbm %s1312_s5, 256 }
 0x375   : > { %p1038_p13 = scmp.ne.s32.totalorder %s655_s29, %s1037_s27  ;;  %p1042_p4 = scmp.lt.s32.totalorder %s655_s29, %s1312_s5 }
 0x376   : > { %p1043_p8 = scmp.lt.s32.totalorder %s1041_s26, %s1037_s27 }
 0x377   : > { %p1039_p5 = pnand %p1038_p13, %p1328_p0 }
 0x378   : > { %p1044_p7 = por %p1043_p8, %p1042_p4 }
 0x379   : > { %p1040_p10 = pneg %p1039_p5 }
 0x37b   : > { %p1045_p11 = pnand %p1044_p7, %p1040_p10 }
 0x37d   : > { %1048 = shalt.err (!%p1045_p11)
}
 0x37e   : > { %827 = dma.vmem_to_hbm [thread:$0]  (%p1328_p0), %s658_s6, 128, %s655_s29, %s644_s9  }
 0x37f PF: > { %s669_s13 = sand.u32 1, %s1079_s18   ;;  %p1329_p1 = scmp.ne.s32.totalorder %s1318_s25, 0 }
 0x380   : > { %p1330_p2 = scmp.ge.s32.totalorder %s1091_s21, 2  ;;  %s670_s14 = scalar_lea.sflag [#allocation4], %s669_s13 }
 0x382   : > { %p841_p6 = pnand %p1330_p2, %p1329_p1 }
 0x384   : > { %p842_p12 = pneg %p841_p6 }
 0x386   : > { %1074 = dma.done.wait (%p842_p12), %s670_s14, 128  }
 0x387   : > { %1076 = vsyncadd (%p842_p12), %s670_s14, 4294967168  ;;  %p19_p3 = scmp.ge.s32.totalorder %s1204_s17, 4   ;;  %s1331_s18 = smov %s1083_s19 }
 0x388   : > { %s1332_s19 = smov %s1087_s20  ;;  %s1333_s20 = smov %s1213_s28 }
 0x389   : > { %s1334_s21 = smov %s1204_s17  ;;  %21 = sbr.rel (!%p19_p3) target bundleno = 6 (0x6), region = 93 }
 0x38e   :  { %675 = vsyncpa [#allocation3], 1 }
 0x38f   :  { %677 = vsyncpa [#allocation3 + $0x1], 1 }
 0x390   :  { %678 = vsyncpa [#allocation6], 1 }
 0x391   :  { %679 = vsyncpa [#allocation4], 1 }
 0x392   :  { %681 = vsyncpa [#allocation4 + $0x1], 1 }

</bundles_post_ra>
